<compile_context>
chip_gen: v5e
topology: v5e:2x2
jax: 0.10.0
libtpu: 0.0.40
codegen_flags: <defaults>
</compile_context>

<pallas_src>
import functools

import jax
import jax.numpy as jnp
from jax import lax
from jax.experimental import pallas as pl
from jax.experimental.pallas import tpu as pltpu


def _cross_attention_kernel(xc_ref, w_ref, b_ref, o_ref, *, n, e, dq, dc, bb):
    # Packed, pre-transposed parameters (scale already folded into Wq^T / bq).
    w = w_ref[...]                          # (R, 3E + Dq), R = max(Dq+Dc, E)
    b = b_ref[...]                          # (1, 3E + Dq)
    w_in = w[:dq + dc, :3 * e]              # (Dq+Dc, 3E)  block-diag [Wq^T*s ; [Wk;Wv]^T]
    wo_t = w[:e, 3 * e:]                    # (E, Dq)      == Wo^T
    b_in = b[:, :3 * e]                     # (1, 3E)      [bq*s, bk, bv]
    bo = b[:, 3 * e:]                       # (1, Dq)

    xc = xc_ref[...]                        # (bb*N, Dq+Dc)  == [x | c]

    # Single fused projection for q (pre-scaled), k and v across all bb batches.
    qkv = jnp.dot(xc, w_in, preferred_element_type=jnp.float32) + b_in  # (bb*N, 3E)
    q_all = qkv[:, :e]
    k_all = qkv[:, e:2 * e]
    v_all = qkv[:, 2 * e:]

    # Per-batch (E, E) logits (bb is static -> unrolled at trace time), stacked
    # along sublanes so the softmax runs ONCE over the whole (bb*E, E) stack.
    logit_parts = []
    for lb in range(bb):
        lo, hi = lb * n, (lb + 1) * n
        # logits[e, f] = sum_n q[n, e] * k[n, f]   (scale already in q)
        logit_parts.append(
            lax.dot_general(q_all[lo:hi, :], k_all[lo:hi, :],
                            (((0,), (0,)), ((), ())),
                            preferred_element_type=jnp.float32))        # (E, E)
    logits = logit_parts[0] if bb == 1 else jnp.concatenate(logit_parts, axis=0)

    m = jnp.max(logits, axis=-1, keepdims=True)
    p = jnp.exp(logits - m)
    denom = jnp.sum(p, axis=-1, keepdims=True)
    attn_w = p * pl.reciprocal(denom, approx=True)                      # (bb*E, E)

    # attn_n[n, e] = sum_f v[n, f] * attn_w[e, f]  -- keeps N on sublanes.
    attn_parts = []
    for lb in range(bb):
        v = v_all[lb * n:(lb + 1) * n, :]                               # (N, E)
        aw = attn_w[lb * e:(lb + 1) * e, :]                             # (E, E)
        attn_parts.append(
            lax.dot_general(v, aw, (((1,), (1,)), ((), ())),
                            preferred_element_type=jnp.float32))        # (N, E)
    attn_all = attn_parts[0] if bb == 1 else jnp.concatenate(attn_parts, axis=0)

    # Fused output projection + single contiguous store for the whole chunk.
    out = jnp.dot(attn_all, wo_t, preferred_element_type=jnp.float32) + bo
    o_ref[...] = out.astype(o_ref.dtype)


def pack_cross_attention_params(params, n):
    """One-time packing of the 8 Linear params into (w_slab, b_slab).

    Hoisted off the per-call critical path: call once at parameter-load time.
    Folds the N**-0.5 softmax scale into Wq^T / bq (algebraically identical).
    """
    wq, bq, wk, bk, wv, bv, wo, bo = params
    e, dq = wq.shape
    dc = wk.shape[1]
    scale = float(n) ** -0.5

    # Block-structured fused input-projection weight (Dq+Dc, 3E):
    #   [x | c] @ W_in = [x @ (Wq^T * s) | c @ [Wk;Wv]^T]
    wq_t = wq.T.astype(jnp.float32) * scale                 # (Dq, E)
    wkv_t = jnp.concatenate([wk, wv], axis=0).T             # (Dc, 2E)
    w_in = jnp.zeros((dq + dc, 3 * e), jnp.float32)
    w_in = w_in.at[:dq, :e].set(wq_t)
    w_in = w_in.at[dq:, e:].set(wkv_t)

    wo_t = wo.T                                             # (E, Dq)
    r = max(dq + dc, e)

    def _pad_rows(a):
        return jnp.pad(a, ((0, r - a.shape[0]), (0, 0)))

    w_slab = jnp.concatenate([_pad_rows(w_in), _pad_rows(wo_t)], axis=1)  # (R, 3E+Dq)
    b_slab = jnp.concatenate([bq * scale, bk, bv, bo]).reshape(1, -1)     # (1, 3E+Dq)
    return w_slab, b_slab


def _default_batch_chunks(B):
    # Split the batch across grid steps only where the "parallel" axis maps to
    # two TensorCores (v7x has 2 TCs/chip).  On single-TC v5e/v6e the grid is
    # a sequential loop, so one step avoids ~0.35us/step pipeline overhead.
    try:
        kind = jax.devices()[0].device_kind.lower()
        two_tc = ("v7" in kind) or ("7x" in kind)
    except Exception:
        two_tc = False
    if two_tc and B >= 2 and B % 2 == 0:
        return 2
    return 1


def cross_attention(x, c, packed_params, *, batch_chunks=None):
    """x: (B, N, Dq), c: (B, N, Dc), packed_params from pack_cross_attention_params."""
    B, N, Dq = x.shape
    _, _, Dc = c.shape
    w_slab, b_slab = packed_params
    R, cols = w_slab.shape
    E = (cols - Dq) // 3
    assert R == max(Dq + Dc, E) and cols == 3 * E + Dq, "packed params mismatch"

    if batch_chunks is None:
        batch_chunks = _default_batch_chunks(B)
    assert B % batch_chunks == 0, "batch_chunks must divide B"
    bb = B // batch_chunks

    # Concatenate x|c along lanes and flatten batch into the sublane axis:
    # one 2-D activation operand, one contiguous (bb*N, Dq+Dc) load per chunk.
    xc = jnp.concatenate([x, c], axis=-1).reshape(B * N, Dq + Dc)

    kernel = functools.partial(_cross_attention_kernel,
                               n=N, e=E, dq=Dq, dc=Dc, bb=bb)

    out2 = pl.pallas_call(
        kernel,
        out_shape=jax.ShapeDtypeStruct((B * N, Dq), x.dtype),
        grid_spec=pltpu.PrefetchScalarGridSpec(
            num_scalar_prefetch=0,
            grid=(batch_chunks,),
            in_specs=[
                pl.BlockSpec((bb * N, Dq + Dc), lambda i: (i, 0)),  # [x|c] chunk
                pl.BlockSpec((R, cols), lambda i: (0, 0)),          # packed weights
                pl.BlockSpec((1, cols), lambda i: (0, 0)),          # packed biases
            ],
            out_specs=pl.BlockSpec((bb * N, Dq), lambda i: (i, 0)),
        ),
        compiler_params=pltpu.CompilerParams(
            dimension_semantics=("parallel",)),
    )(xc, w_slab, b_slab)

    return out2.reshape(B, N, Dq)


def _reference(x, c, params):
    wq, bq, wk, bk, wv, bv, wo, bo = params
    B, N, Dq = x.shape
    q = jnp.einsum('bnd,ed->bne', x, wq) + bq
    k = jnp.einsum('bnd,ed->bne', c, wk) + bk
    v = jnp.einsum('bnd,ed->bne', c, wv) + bv
    aw = jnp.einsum('bne,bnf->bef', q, k) * (N ** -0.5)
    aw = jax.nn.softmax(aw, axis=-1)
    attn = jnp.einsum('bef,bnf->bne', aw, v)            # (B, N, E)
    return jnp.einsum('bne,de->bnd', attn, wo) + bo


def _init_linear(key, out_dim, in_dim):
    kw, kb = jax.random.split(key)
    bound = 1.0 / (in_dim ** 0.5)
    w = jax.random.uniform(kw, (out_dim, in_dim), jnp.float32, -bound, bound)
    b = jax.random.uniform(kb, (out_dim,), jnp.float32, -bound, bound)
    return w, b


if __name__ == "__main__":
    B, N, QRY_DIM, CON_DIM, EMBED_DIM = 4, 8, 32, 16, 32

    key = jax.random.PRNGKey(0)
    kx, kc, k1, k2, k3, k4 = jax.random.split(key, 6)

    x = jax.random.normal(kx, (B, N, QRY_DIM), jnp.float32)
    c = jax.random.normal(kc, (B, N, CON_DIM), jnp.float32)

    wq, bq = _init_linear(k1, EMBED_DIM, QRY_DIM)
    wk, bk = _init_linear(k2, EMBED_DIM, CON_DIM)
    wv, bv = _init_linear(k3, EMBED_DIM, CON_DIM)
    wo, bo = _init_linear(k4, QRY_DIM, EMBED_DIM)
    params = (wq, bq, wk, bk, wv, bv, wo, bo)

    # One-time parameter packing, off the per-call hot path.
    packed = tuple(jax.block_until_ready(p)
                   for p in pack_cross_attention_params(params, N))

    out = jax.block_until_ready(cross_attention(x, c, packed))
    ref = _reference(x, c, params)

    assert out.shape == (B, N, QRY_DIM)
    # Slightly relaxed tolerance: pl.reciprocal(approx=True) perturbs the
    # softmax normalizer at the ~1e-5..1e-4 relative level.
    max_err = float(jnp.max(jnp.abs(out - ref)))
    assert jnp.allclose(out, ref, atol=5e-4, rtol=5e-3), \
        f"mismatch vs reference (max abs err {max_err})"

    print("KERNEL_OK")
</pallas_src>

<mosaic_0001>
module attributes {stable_mosaic.version = 11 : i64} {
  func.func @_cross_attention_kernel(%arg0: i32, %arg1: memref<32x48xf32, #tpu.memory_space<vmem>>, %arg2: memref<48x128xf32, #tpu.memory_space<vmem>>, %arg3: memref<1x128xf32, #tpu.memory_space<vmem>>, %arg4: memref<32x32xf32, #tpu.memory_space<vmem>>) attributes {dimension_semantics = [#tpu.dimension_semantics<parallel>], iteration_bounds = array<i64: 1>, scalar_prefetch = 0 : i64, scratch_operands = 0 : i64, tpu.core_type = #tpu.core_type<tc>, window_params = [{transform_indices = @transform_0, window_bounds = array<i64: 32, 48>}, {pipeline_mode = #tpu.pipeline_mode<synchronous>, transform_indices = @transform_1, window_bounds = array<i64: 48, 128>}, {pipeline_mode = #tpu.pipeline_mode<synchronous>, transform_indices = @transform_2, window_bounds = array<i64: 1, 128>}, {transform_indices = @transform_3, window_bounds = array<i64: 32, 32>}]} {
    %c0 = arith.constant 0 : index
    %c0_0 = arith.constant 0 : index
    %0 = vector.load %arg2[%c0, %c0_0] : memref<48x128xf32, #tpu.memory_space<vmem>>, vector<48x128xf32>
    %c0_1 = arith.constant 0 : index
    %c0_2 = arith.constant 0 : index
    %1 = vector.load %arg3[%c0_1, %c0_2] : memref<1x128xf32, #tpu.memory_space<vmem>>, vector<1x128xf32>
    %2 = vector.extract_strided_slice %0 {offsets = [0, 0], sizes = [48, 96], strides = [1, 1]} : vector<48x128xf32> to vector<48x96xf32>
    %3 = vector.extract_strided_slice %0 {offsets = [0, 96], sizes = [32, 32], strides = [1, 1]} : vector<48x128xf32> to vector<32x32xf32>
    %4 = vector.extract_strided_slice %1 {offsets = [0, 0], sizes = [1, 96], strides = [1, 1]} : vector<1x128xf32> to vector<1x96xf32>
    %5 = vector.extract_strided_slice %1 {offsets = [0, 96], sizes = [1, 32], strides = [1, 1]} : vector<1x128xf32> to vector<1x32xf32>
    %c0_3 = arith.constant 0 : index
    %c0_4 = arith.constant 0 : index
    %6 = vector.load %arg1[%c0_3, %c0_4] : memref<32x48xf32, #tpu.memory_space<vmem>>, vector<32x48xf32>
    %cst = arith.constant dense<0.000000e+00> : vector<32x96xf32>
    %7 = tpu.matmul %6, %2, %cst {dimension_numbers = #tpu.dot_dimension_numbers<[1], [0], [0], [1], [0, 0, 1, 1], [], []>} : vector<32x48xf32>, vector<48x96xf32>, vector<32x96xf32> -> vector<32x96xf32>
    %8 = vector.broadcast %4 : vector<1x96xf32> to vector<32x96xf32>
    %9 = arith.addf %7, %8 : vector<32x96xf32>
    %10 = vector.extract_strided_slice %9 {offsets = [0, 0], sizes = [32, 32], strides = [1, 1]} : vector<32x96xf32> to vector<32x32xf32>
    %11 = vector.extract_strided_slice %9 {offsets = [0, 32], sizes = [32, 32], strides = [1, 1]} : vector<32x96xf32> to vector<32x32xf32>
    %12 = vector.extract_strided_slice %9 {offsets = [0, 64], sizes = [32, 32], strides = [1, 1]} : vector<32x96xf32> to vector<32x32xf32>
    %13 = vector.extract_strided_slice %10 {offsets = [0, 0], sizes = [8, 32], strides = [1, 1]} : vector<32x32xf32> to vector<8x32xf32>
    %14 = vector.extract_strided_slice %11 {offsets = [0, 0], sizes = [8, 32], strides = [1, 1]} : vector<32x32xf32> to vector<8x32xf32>
    %cst_5 = arith.constant dense<0.000000e+00> : vector<32x32xf32>
    %15 = tpu.matmul %13, %14, %cst_5 {dimension_numbers = #tpu.dot_dimension_numbers<[0], [0], [1], [1], [0, 1, 1, 1], [], []>} : vector<8x32xf32>, vector<8x32xf32>, vector<32x32xf32> -> vector<32x32xf32>
    %16 = vector.extract_strided_slice %10 {offsets = [8, 0], sizes = [8, 32], strides = [1, 1]} : vector<32x32xf32> to vector<8x32xf32>
    %17 = vector.extract_strided_slice %11 {offsets = [8, 0], sizes = [8, 32], strides = [1, 1]} : vector<32x32xf32> to vector<8x32xf32>
    %cst_6 = arith.constant dense<0.000000e+00> : vector<32x32xf32>
    %18 = tpu.matmul %16, %17, %cst_6 {dimension_numbers = #tpu.dot_dimension_numbers<[0], [0], [1], [1], [0, 1, 1, 1], [], []>} : vector<8x32xf32>, vector<8x32xf32>, vector<32x32xf32> -> vector<32x32xf32>
    %19 = vector.extract_strided_slice %10 {offsets = [16, 0], sizes = [8, 32], strides = [1, 1]} : vector<32x32xf32> to vector<8x32xf32>
    %20 = vector.extract_strided_slice %11 {offsets = [16, 0], sizes = [8, 32], strides = [1, 1]} : vector<32x32xf32> to vector<8x32xf32>
    %cst_7 = arith.constant dense<0.000000e+00> : vector<32x32xf32>
    %21 = tpu.matmul %19, %20, %cst_7 {dimension_numbers = #tpu.dot_dimension_numbers<[0], [0], [1], [1], [0, 1, 1, 1], [], []>} : vector<8x32xf32>, vector<8x32xf32>, vector<32x32xf32> -> vector<32x32xf32>
    %22 = vector.extract_strided_slice %10 {offsets = [24, 0], sizes = [8, 32], strides = [1, 1]} : vector<32x32xf32> to vector<8x32xf32>
    %23 = vector.extract_strided_slice %11 {offsets = [24, 0], sizes = [8, 32], strides = [1, 1]} : vector<32x32xf32> to vector<8x32xf32>
    %cst_8 = arith.constant dense<0.000000e+00> : vector<32x32xf32>
    %24 = tpu.matmul %22, %23, %cst_8 {dimension_numbers = #tpu.dot_dimension_numbers<[0], [0], [1], [1], [0, 1, 1, 1], [], []>} : vector<8x32xf32>, vector<8x32xf32>, vector<32x32xf32> -> vector<32x32xf32>
    %25 = tpu.concatenate %15, %18, %21, %24 in 0 : vector<32x32xf32>, vector<32x32xf32>, vector<32x32xf32>, vector<32x32xf32> -> vector<128x32xf32>
    %cst_9 = arith.constant dense<0xFF800000> : vector<128xf32>
    %26 = vector.multi_reduction <maximumf>, %25, %cst_9 [1] : vector<128x32xf32> to vector<128xf32>
    %27 = vector.shape_cast %26 : vector<128xf32> to vector<128x1xf32>
    %28 = vector.broadcast %27 : vector<128x1xf32> to vector<128x32xf32>
    %29 = arith.subf %25, %28 : vector<128x32xf32>
    %30 = math.exp %29 : vector<128x32xf32>
    %cst_10 = arith.constant dense<0.000000e+00> : vector<128xf32>
    %31 = vector.multi_reduction <add>, %30, %cst_10 [1] : vector<128x32xf32> to vector<128xf32>
    %32 = vector.shape_cast %31 : vector<128xf32> to vector<128x1xf32>
    %33 = tpu.reciprocal %32 {approx = true} : vector<128x1xf32> -> vector<128x1xf32>
    %34 = vector.broadcast %33 : vector<128x1xf32> to vector<128x32xf32>
    %35 = arith.mulf %30, %34 : vector<128x32xf32>
    %36 = vector.extract_strided_slice %12 {offsets = [0, 0], sizes = [8, 32], strides = [1, 1]} : vector<32x32xf32> to vector<8x32xf32>
    %37 = vector.extract_strided_slice %35 {offsets = [0, 0], sizes = [32, 32], strides = [1, 1]} : vector<128x32xf32> to vector<32x32xf32>
    %cst_11 = arith.constant dense<0.000000e+00> : vector<8x32xf32>
    %38 = tpu.matmul %36, %37, %cst_11 {dimension_numbers = #tpu.dot_dimension_numbers<[1], [1], [0], [0], [0, 0, 1, 0], [], []>} : vector<8x32xf32>, vector<32x32xf32>, vector<8x32xf32> -> vector<8x32xf32>
    %39 = vector.extract_strided_slice %12 {offsets = [8, 0], sizes = [8, 32], strides = [1, 1]} : vector<32x32xf32> to vector<8x32xf32>
    %40 = vector.extract_strided_slice %35 {offsets = [32, 0], sizes = [32, 32], strides = [1, 1]} : vector<128x32xf32> to vector<32x32xf32>
    %cst_12 = arith.constant dense<0.000000e+00> : vector<8x32xf32>
    %41 = tpu.matmul %39, %40, %cst_12 {dimension_numbers = #tpu.dot_dimension_numbers<[1], [1], [0], [0], [0, 0, 1, 0], [], []>} : vector<8x32xf32>, vector<32x32xf32>, vector<8x32xf32> -> vector<8x32xf32>
    %42 = vector.extract_strided_slice %12 {offsets = [16, 0], sizes = [8, 32], strides = [1, 1]} : vector<32x32xf32> to vector<8x32xf32>
    %43 = vector.extract_strided_slice %35 {offsets = [64, 0], sizes = [32, 32], strides = [1, 1]} : vector<128x32xf32> to vector<32x32xf32>
    %cst_13 = arith.constant dense<0.000000e+00> : vector<8x32xf32>
    %44 = tpu.matmul %42, %43, %cst_13 {dimension_numbers = #tpu.dot_dimension_numbers<[1], [1], [0], [0], [0, 0, 1, 0], [], []>} : vector<8x32xf32>, vector<32x32xf32>, vector<8x32xf32> -> vector<8x32xf32>
    %45 = vector.extract_strided_slice %12 {offsets = [24, 0], sizes = [8, 32], strides = [1, 1]} : vector<32x32xf32> to vector<8x32xf32>
    %46 = vector.extract_strided_slice %35 {offsets = [96, 0], sizes = [32, 32], strides = [1, 1]} : vector<128x32xf32> to vector<32x32xf32>
    %cst_14 = arith.constant dense<0.000000e+00> : vector<8x32xf32>
    %47 = tpu.matmul %45, %46, %cst_14 {dimension_numbers = #tpu.dot_dimension_numbers<[1], [1], [0], [0], [0, 0, 1, 0], [], []>} : vector<8x32xf32>, vector<32x32xf32>, vector<8x32xf32> -> vector<8x32xf32>
    %48 = tpu.concatenate %38, %41, %44, %47 in 0 : vector<8x32xf32>, vector<8x32xf32>, vector<8x32xf32>, vector<8x32xf32> -> vector<32x32xf32>
    %cst_15 = arith.constant dense<0.000000e+00> : vector<32x32xf32>
    %49 = tpu.matmul %48, %3, %cst_15 {dimension_numbers = #tpu.dot_dimension_numbers<[1], [0], [0], [1], [0, 0, 1, 1], [], []>} : vector<32x32xf32>, vector<32x32xf32>, vector<32x32xf32> -> vector<32x32xf32>
    %50 = vector.broadcast %5 : vector<1x32xf32> to vector<32x32xf32>
    %51 = arith.addf %49, %50 : vector<32x32xf32>
    %c0_16 = arith.constant 0 : index
    %c0_17 = arith.constant 0 : index
    %52 = vector.load %arg4[%c0_16, %c0_17] : memref<32x32xf32, #tpu.memory_space<vmem>>, vector<32x32xf32>
    tpu.vector_store %arg4[%c0_16, %c0_17], %51 {strides = array<i32>} : memref<32x32xf32, #tpu.memory_space<vmem>>, vector<32x32xf32>,
    return
  }
  func.func @transform_0(%arg0: i32) -> (i32, i32) {
    %c0_i32 = arith.constant 0 : i32
    %c0_i32_0 = arith.constant 0 : i32
    return %arg0, %c0_i32 : i32, i32
  }
  func.func @transform_1(%arg0: i32) -> (i32, i32) {
    %c0_i32 = arith.constant 0 : i32
    %c0_i32_0 = arith.constant 0 : i32
    %c0_i32_1 = arith.constant 0 : i32
    return %c0_i32, %c0_i32_0 : i32, i32
  }
  func.func @transform_2(%arg0: i32) -> (i32, i32) {
    %c0_i32 = arith.constant 0 : i32
    %c0_i32_0 = arith.constant 0 : i32
    %c0_i32_1 = arith.constant 0 : i32
    return %c0_i32, %c0_i32_0 : i32, i32
  }
  func.func @transform_3(%arg0: i32) -> (i32, i32) {
    %c0_i32 = arith.constant 0 : i32
    %c0_i32_0 = arith.constant 0 : i32
    return %arg0, %c0_i32 : i32, i32
  }
}

</mosaic_0001>

<bundles_post_ra>
// kernel: tpu_custom_call.1
= control target key start
LH: loop header
LB: loop body
LE: loop exit
PB: predicated region body
PF: predicated region fallthrough
CT: control target
= control target key end

     0   :  { %8 = vsyncpa [#allocation3], 0  ;;  %s1333_s0 = inlined_call_operand.hbm [shape: f32[32,48], index: 0, kind: input, shape index: {}]   ;;  %s1334_s1 = inlined_call_operand.hbm [shape: f32[48,128], index: 1, kind: input, shape index: {}]   ;;  %s1335_s2 = inlined_call_operand.vmem [shape: f32[1,128], index: 2, kind: input, shape index: {}]   ;;  %s1336_s3 = inlined_call_operand.hbm [shape: f32[32,32], index: 3, kind: output, shape index: {}]  }
   0x1   :  { %9 = vsyncpa [#allocation6], 0 }
   0x2   :  { %10 = vsyncpa [#allocation4], 0  ;;  %s15_s14 = sshll.u32 %s1333_s0, 4  ;;  %s1037_s15 = smov [#allocation2]   ;;  %s16_s14 = int_to_ptr.hbm [resolvable:$true] %s15_s14 }
   0x3   :  { %s17_s16 = sshll.u32 %s1037_s15, 4  ;;  %s28_s19 = sshll.u32 %s1334_s1, 4  ;;  %s18_s16 = int_to_ptr.vmem [resolvable:$true] %s17_s16  ;;  %s29_s19 = int_to_ptr.hbm [resolvable:$true] %s28_s19 }
   0x4   :  { %s1038_s20 = smov 128   ;;  %s1039_s21 = smov 8  }
   0x5   :  { %23 = dma.hbm_to_vmem [thread:$0]  %s16_s14, 512, %s18_s16, [#allocation3], %s1038_s20, %s1038_s20, %s1039_s21  }
   0x6   :  { %s1040_s22 = smov [#allocation5]  }
   0x7   :  { %s30_s23 = sshll.u32 %s1040_s22, 4  ;;  %s31_s23 = int_to_ptr.vmem [resolvable:$true] %s30_s23 }
   0x8   :  { %36 = dma.hbm_to_vmem [thread:$0]  %s29_s19, 768, %s31_s23, [#allocation6], %s1038_s20, %s1038_s20, %s1039_s21  }
   0x9   :  { %1031 = dma.done.wait [#allocation3], 512  }
   0xa   :  { %1032 = vsyncadd [#allocation3], 4294966784 }
   0xb   :  { %1033 = dma.done.wait [#allocation6], 768  }
   0xc   :  { %1034 = vsyncadd [#allocation6], 4294966528  ;;  %v52_v0 = vld [vmem:[#allocation5 + $0x28] sm:$0xff]  ;;  %v51_v1 = vld [vmem:[#allocation5 + $0x20] sm:$0xff]  ;;  %vm61_vm0 = vcmask 392192   ;;  %s1041_s24 = smov 96  }
   0xd   :  { %v1077_v2 = vld [vmem:[#allocation5 + $0x18] sm:$0xff]  ;;  %84 = vmatpush.msra.mxu0 %v52_v0  ;;  %v1079_v3 = vld [vmem:[#allocation5 + $0x10] sm:$0xff]  ;;  %v1081_v4 = vld [vmem:[#allocation5 + $0x8] sm:$0xff]  ;;  %vm139_vm1 = vcmask 64512   ;;  %vm412_vm2 = vcmask 261120   ;;  %s1043_s25 = smov 32  }
   0xe   :  { %v1083_v5 = vld [vmem:[#allocation5] sm:$0xff]  ;;  %v884_v6 = vpack.i.bf16 %v1079_v3, %v1077_v2  ;;  %v55_v9 = vld [vmem:[#allocation2 + $0x8] sm:$0xff]  ;;  %v56_v10 = vld [vmem:[#allocation2 + $0x10] sm:$0xff]  ;;  %s1044_s26 = smov [#allocation7]   ;;  %s803_s30 = sshll.u32 %s1336_s3, 4  ;;  %s804_s30 = int_to_ptr.hbm [resolvable:$true] %s803_s30 }
   0xf   :  { %v889_v7 = vpack.i.bf16 %v1083_v5, %v1081_v4  ;;  %85 = vmatpush.msra.mxu0 %v51_v1  ;;  %v54_v8 = vld [vmem:[#allocation2] sm:$0xff]  ;;  %v57_v11 = vld [vmem:[#allocation2 + $0x18] sm:$0xff]  ;;  %s801_s27 = sshll.u32 %s1044_s26, 4  ;;  %s802_s27 = int_to_ptr.vmem [resolvable:$true] %s801_s27 }
  0x10   :  { %v1096_v13 = vld [vmem:[%s1335_s2] ss:$0 sm:$0xff]  ;;  %s1042_s2 = smov 64  }
  0x11   :  { %86 = vmatpush.msra.mxu0 %v1077_v2 }
  0x13   :  { %87 = vmatpush.msra.mxu0 %v1079_v3 }
  0x15   :  { %88 = vmatpush.msra.mxu0 %v1081_v4 }
  0x17   :  { %89 = vmatpush.msra.mxu0 %v1083_v5 }
  0x18   :  { %817 = vmatmul.msk.f32.vlgmr.msra.gmra.mxu0 %vm61_vm0, %v54_v8 }
  0x20   :  { %818 = vmatmul.msk.f32.gmra.mxu0 %vm61_vm0, %v55_v9 }
  0x28   :  { %819 = vmatmul.msk.f32.gmra.mxu0 %vm61_vm0, %v56_v10 }
  0x30   :  { %820 = vmatmul.msk.f32.gmra.mxu0 %vm61_vm0, %v57_v11 }
  0x95   :  { %v91_v12 = vpop.f32.mrf.mxu0 }
  0x96   :  { %v1099_v15 = vadd.f32 %v1096_v13, %v91_v12 }
  0x9d   :  { %v94_v14 = vpop.f32.mrf.mxu0 }
  0x9e   :  { %v1102_v16 = vadd.f32 %v1096_v13, %v94_v14 }
  0xa0   :  { %v874_v17 = vpack.i.bf16 %v1102_v16, %v1099_v15 }
  0xa2   :  { %875 = vrot.lane.b32.xlu0 %v874_v17, %s1041_s24 }
  0xa5   :  { %v97_v18 = vpop.f32.mrf.mxu0 }
  0xa6   :  { %v1107_v19 = vadd.f32 %v1096_v13, %v97_v18 }
  0xa8   :  { %258 = vxpose.xlu2.b32.start.end [1/1] (short) (narrow) %v1107_v19, 32 }
  0xad   :  { %v100_v20 = vpop.f32.mrf.mxu0 }
  0xae   :  { %v1111_v21 = vadd.f32 %v1096_v13, %v100_v20 }
  0xb0   :  { %v879_v22 = vpack.i.bf16 %v1111_v21, %v1107_v19 }
  0xb2   :  { %880 = vrot.lane.b32.xlu1 %v879_v22, %s1041_s24 }
  0xc4   :  { %103 = vxpose.xlu0.b32.start.end [1/1] (short) (narrow) %v1099_v15, 32 }
  0xc8   :  { %335 = vxpose.xlu2.b32.start.end [1/1] (short) (narrow) %v1111_v21, 32 }
  0xe7   :  { %181 = vxpose.xlu1.b32.start.end [1/1] (short) (narrow) %v1102_v16, 32 }
 0x114   :  { %v876_v23 = vpop.permute.xlu0 %875 }
 0x115   :  { %v877_v24 = vunpack.i.l.bf16 %v876_v23  ;;  %v878_v25 = vunpack.i.h.bf16 %v876_v23 }
 0x117   :  { %167 = vmatpush.msra.mxu1 %v877_v24  ;;  %244 = vmatpush.msra.mxu2 %v878_v25 }
 0x124   :  { %v881_v26 = vpop.permute.xlu1 %880 }
 0x125   :  { %v882_v27 = vunpack.i.l.bf16 %v881_v26  ;;  %v883_v28 = vunpack.i.h.bf16 %v881_v26 }
 0x127   :  { %321 = vmatpush.msra.mxu3 %v882_v27  ;;  %398 = vmatpush.msrb.mxu1 %v883_v28 }
 0x141   :  { %v274_v29 = vpop.trf.xlu2 }
 0x142   :  { %829 = vmatmul.msk.f32.vlgmr.msra.gmra.mxu3 %vm139_vm1, %v274_v29 }
 0x149   :  { %v275_v30 = vpop.trf.xlu2 }
 0x14a   :  { %830 = vmatmul.msk.f32.gmra.mxu3 %vm139_vm1, %v275_v30 }
 0x151   :  { %v276_v32 = vpop.trf.xlu2 }
 0x152   :  { %831 = vmatmul.msk.f32.gmra.mxu3 %vm139_vm1, %v276_v32 }
 0x159   :  { %v277_v34 = vpop.trf.xlu2 }
 0x15a   :  { %832 = vmatmul.msk.f32.gmra.mxu3 %vm139_vm1, %v277_v34 }
 0x161   :  { %v351_v37 = vpop.trf.xlu2 }
 0x168   :  { %v119_v31 = vpop.trf.xlu0 }
 0x169   :  { %821 = vmatmul.msk.f32.vlgmr.msra.gmra.mxu1 %vm139_vm1, %v119_v31  ;;  %v352_v38 = vpop.trf.xlu2 }
 0x170   :  { %v120_v33 = vpop.trf.xlu0 }
 0x171   :  { %822 = vmatmul.msk.f32.gmra.mxu1 %vm139_vm1, %v120_v33  ;;  %v353_v41 = vpop.trf.xlu2 }
 0x178   :  { %v121_v35 = vpop.trf.xlu0 }
 0x179   :  { %823 = vmatmul.msk.f32.gmra.mxu1 %vm139_vm1, %v121_v35  ;;  %v354_v43 = vpop.trf.xlu2 }
 0x180   :  { %v122_v36 = vpop.trf.xlu0 }
 0x181   :  { %824 = vmatmul.msk.f32.gmra.mxu1 %vm139_vm1, %v122_v36 }
 0x189   :  { %833 = vmatmul.msk.f32.vlgmr.msrb.gmra.mxu1 %vm139_vm1, %v351_v37 }
 0x18b   :  { %v197_v39 = vpop.trf.xlu1 }
 0x18c   :  { %825 = vmatmul.msk.f32.vlgmr.msra.gmra.mxu2 %vm139_vm1, %v197_v39 }
 0x191   :  { %834 = vmatmul.msk.f32.gmra.mxu1 %vm139_vm1, %v352_v38 }
 0x193   :  { %v198_v40 = vpop.trf.xlu1 }
 0x194   :  { %826 = vmatmul.msk.f32.gmra.mxu2 %vm139_vm1, %v198_v40 }
 0x199   :  { %835 = vmatmul.msk.f32.gmra.mxu1 %vm139_vm1, %v353_v41 }
 0x19b   :  { %v199_v42 = vpop.trf.xlu1 }
 0x19c   :  { %827 = vmatmul.msk.f32.gmra.mxu2 %vm139_vm1, %v199_v42 }
 0x1a1   :  { %836 = vmatmul.msk.f32.gmra.mxu1 %vm139_vm1, %v354_v43 }
 0x1a3   :  { %v200_v44 = vpop.trf.xlu1 }
 0x1a4   :  { %828 = vmatmul.msk.f32.gmra.mxu2 %vm139_vm1, %v200_v44 }
 0x1c5   :  { %v1142_v55 = vpop.f32.mrf.mxu3 }
 0x1c6   :  { %v437_v57 = vsel %vm412_vm2, %v1142_v55, -inf }
 0x1cd   :  { %v1152_v60 = vpop.f32.mrf.mxu3 }
 0x1ce   :  { %v440_v63 = vsel %vm412_vm2, %v1152_v60, -inf }
 0x1d5   :  { %v1178_v18 = vpop.f32.mrf.mxu3 }
 0x1d6   :  { %v443_v20 = vsel %vm412_vm2, %v1178_v18, -inf }
 0x1dd   :  { %v1182_v22 = vpop.f32.mrf.mxu3 }
 0x1de   :  { %v446_v23 = vsel %vm412_vm2, %v1182_v22, -inf }
 0x1e6   :  { %v169_v45 = vpop.f32.mrf.mxu1 }
 0x1e7   :  { %v413_v46 = vsel %vm412_vm2, %v169_v45, -inf }
 0x1e8   :  { %414 = vmax.xlane.f32.xlu0 %v413_v46 }
 0x1ee   :  { %v172_v47 = vpop.f32.mrf.mxu1 }
 0x1ef   :  { %v416_v48 = vsel %vm412_vm2, %v172_v47, -inf }
 0x1f0   :  { %417 = vmax.xlane.f32.xlu0 %v416_v48 }
 0x1f6   :  { %v175_v49 = vpop.f32.mrf.mxu1 }
 0x1f7   :  { %v419_v50 = vsel %vm412_vm2, %v175_v49, -inf }
 0x1f8   :  { %420 = vmax.xlane.f32.xlu0 %v419_v50 }
 0x1fe   :  { %v1137_v51 = vpop.f32.mrf.mxu1 }
 0x1ff   :  { %v422_v62 = vsel %vm412_vm2, %v1137_v51, -inf }
 0x206   :  { %v1139_v52 = vpop.f32.mrf.mxu1 }
 0x207   :  { %v449_v8 = vsel %vm412_vm2, %v1139_v52, -inf }
 0x20e   :  { %v1150_v59 = vpop.f32.mrf.mxu1 }
 0x20f   :  { %v246_v53 = vpop.f32.mrf.mxu2  ;;  %v452_v9 = vsel %vm412_vm2, %v1150_v59, -inf }
 0x210   :  { %v425_v54 = vsel %vm412_vm2, %v246_v53, -inf }
 0x211   :  { %426 = vmax.xlane.f32.xlu1 %v425_v54 }
 0x216   :  { %v1162_v1 = vpop.f32.mrf.mxu1 }
 0x217   :  { %v1144_v56 = vpop.f32.mrf.mxu2  ;;  %v455_v10 = vsel %vm412_vm2, %v1162_v1, -inf }
 0x218   :  { %v428_v58 = vsel %vm412_vm2, %v1144_v56, -inf }
 0x219   :  { %438 = vmax.xlane.f32.xlu1 %v437_v57  ;;  %429 = vmax.xlane.f32.xlu2 %v428_v58 }
 0x21e   :  { %v1172_v12 = vpop.f32.mrf.mxu1 }
 0x21f   :  { %v1154_v61 = vpop.f32.mrf.mxu2  ;;  %v458_v17 = vsel %vm412_vm2, %v1172_v12, -inf }
 0x220   :  { %v431_v0 = vsel %vm412_vm2, %v1154_v61, -inf }
 0x221   :  { %441 = vmax.xlane.f32.xlu2 %v440_v63  ;;  %432 = vmax.xlane.f32.xlu0 %v431_v0 }
 0x222   :  { %423 = vmax.xlane.f32.xlu1 %v422_v62 }
 0x227   :  { %v1170_v11 = vpop.f32.mrf.mxu2 }
 0x228   :  { %v434_v14 = vsel %vm412_vm2, %v1170_v11, -inf }
 0x229   :  { %450 = vmax.xlane.f32.xlu2 %v449_v8  ;;  %453 = vmax.xlane.f32.xlu0 %v452_v9 }
 0x22a   :  { %456 = vmax.xlane.f32.xlu1 %v455_v10 }
 0x231   :  { %435 = vmax.xlane.f32.xlu2 %v434_v14 }
 0x232   :  { %459 = vmax.xlane.f32.xlu1 %v458_v17 }
 0x239   :  { %444 = vmax.xlane.f32.xlu2 %v443_v20 }
 0x241   :  { %447 = vmax.xlane.f32.xlu2 %v446_v23 }
 0x259   :  { %625 = vrot.lane.b32.xlu2 %v1102_v16, %s1042_s2 }
 0x25b   :  { %v415_v24 = vpop.xlane.xlu0 %414 }
 0x25c   :  { %v461_v25 = vsub.f32 %v169_v45, %v415_v24 }
 0x25e   :  { %v477_v26 = vmul.f32 1.442695, %v461_v25 }
 0x260   :  { %895 = vpow2.f32 %v477_v26 }
 0x263   :  { %v418_v27 = vpop.xlane.xlu0 %417 }
 0x264   :  { %v462_v28 = vsub.f32 %v172_v47, %v418_v27 }
 0x266   :  { %v1188_v29 = vpop.eup %895  ;;  %v479_v30 = vmul.f32 1.442695, %v462_v28 }
 0x267   :  { %v509_v31 = vsel %vm412_vm2, %v1188_v29, 0.0 }
 0x268   :  { %897 = vpow2.f32 %v479_v30  ;;  %510 = vadd.xlane.f32.xlu1 %v509_v31 }
 0x26b   :  { %v421_v32 = vpop.xlane.xlu0 %420 }
 0x26c   :  { %v463_v33 = vsub.f32 %v175_v49, %v421_v32 }
 0x26e   :  { %v1192_v34 = vpop.eup %897  ;;  %v481_v35 = vmul.f32 1.442695, %v463_v33 }
 0x26f   :  { %v512_v16 = vsel %vm412_vm2, %v1192_v34, 0.0 }
 0x270   :  { %899 = vpow2.f32 %v481_v35  ;;  %513 = vadd.xlane.f32.xlu1 %v512_v16 }
 0x276   :  { %v1196_v36 = vpop.eup %899 }
 0x277   :  { %v515_v37 = vsel %vm412_vm2, %v1196_v36, 0.0 }
 0x278   :  { %516 = vadd.xlane.f32.xlu1 %v515_v37 }
 0x284   :  { %v427_v38 = vpop.xlane.xlu1 %426 }
 0x285   :  { %v465_v39 = vsub.f32 %v246_v53, %v427_v38 }
 0x287   :  { %v485_v40 = vmul.f32 1.442695, %v465_v39 }
 0x289   :  { %901 = vpow2.f32 %v485_v40 }
 0x28c   :  { %v439_v41 = vpop.xlane.xlu1 %438  ;;  %v430_v42 = vpop.xlane.xlu2 %429 }
 0x28d   :  { %v466_v43 = vsub.f32 %v1144_v56, %v430_v42  ;;  %v469_v46 = vsub.f32 %v1142_v55, %v439_v41 }
 0x28f   :  { %v1201_v44 = vpop.eup %901  ;;  %v487_v45 = vmul.f32 1.442695, %v466_v43  ;;  %v493_v48 = vmul.f32 1.442695, %v469_v46 }
 0x290   :  { %v521_v47 = vsel %vm412_vm2, %v1201_v44, 0.0 }
 0x291   :  { %522 = vadd.xlane.f32.xlu2 %v521_v47  ;;  %903 = vpow2.f32 %v487_v45 }
 0x292   :  { %905 = vpow2.f32 %v493_v48 }
 0x294   :  { %v442_v49 = vpop.xlane.xlu2 %441  ;;  %v433_v50 = vpop.xlane.xlu0 %432 }
 0x295   :  { %v467_v53 = vsub.f32 %v1154_v61, %v433_v50  ;;  %v424_v54 = vpop.xlane.xlu1 %423  ;;  %v470_v62 = vsub.f32 %v1152_v60, %v442_v49 }
 0x296   :  { %v464_v57 = vsub.f32 %v1137_v51, %v424_v54 }
 0x297   :  { %v489_v58 = vmul.f32 1.442695, %v467_v53  ;;  %v1208_v56 = vpop.eup %903  ;;  %v495_v0 = vmul.f32 1.442695, %v470_v62 }
 0x298   :  { %v483_v55 = vmul.f32 1.442695, %v464_v57  ;;  %v524_v63 = vsel %vm412_vm2, %v1208_v56, 0.0  ;;  %v1214_v51 = vpop.eup %905 }
 0x299   :  { %907 = vpow2.f32 %v489_v58  ;;  %525 = vadd.xlane.f32.xlu0 %v524_v63  ;;  %v533_v25 = vsel %vm412_vm2, %v1214_v51, 0.0 }
 0x29a   :  { %909 = vpow2.f32 %v483_v55 }
 0x29b   :  { %911 = vpow2.f32 %v495_v0 }
 0x29c   :  { %v451_v8 = vpop.xlane.xlu2 %450  ;;  %v454_v9 = vpop.xlane.xlu0 %453 }
 0x29d   :  { %v473_v61 = vsub.f32 %v1139_v52, %v451_v8  ;;  %v457_v10 = vpop.xlane.xlu1 %456  ;;  %v474_v60 = vsub.f32 %v1150_v59, %v454_v9 }
 0x29e   :  { %v475_v14 = vsub.f32 %v1162_v1, %v457_v10 }
 0x29f   :  { %v501_v17 = vmul.f32 1.442695, %v473_v61  ;;  %v1217_v20 = vpop.eup %907  ;;  %v503_v1 = vmul.f32 1.442695, %v474_v60 }
 0x2a0   :  { %v505_v23 = vmul.f32 1.442695, %v475_v14  ;;  %v1220_v24 = vpop.eup %909  ;;  %v527_v52 = vsel %vm412_vm2, %v1217_v20, 0.0 }
 0x2a1   :  { %913 = vpow2.f32 %v501_v17  ;;  %v518_v26 = vsel %vm412_vm2, %v1220_v24, 0.0  ;;  %534 = vadd.xlane.f32.xlu0 %v533_v25  ;;  %528 = vadd.xlane.f32.xlu1 %v527_v52  ;;  %v1229_v30 = vpop.eup %911 }
 0x2a2   :  { %915 = vpow2.f32 %v505_v23  ;;  %519 = vadd.xlane.f32.xlu2 %v518_v26  ;;  %v536_v38 = vsel %vm412_vm2, %v1229_v30, 0.0 }
 0x2a3   :  { %917 = vpow2.f32 %v503_v1 }
 0x2a4   :  { %v436_v27 = vpop.xlane.xlu2 %435 }
 0x2a5   :  { %v468_v59 = vsub.f32 %v1170_v11, %v436_v27  ;;  %v460_v28 = vpop.xlane.xlu1 %459 }
 0x2a6   :  { %v476_v31 = vsub.f32 %v1172_v12, %v460_v28 }
 0x2a7   :  { %v1232_v32 = vpop.eup %913  ;;  %v491_v33 = vmul.f32 1.442695, %v468_v59 }
 0x2a8   :  { %v507_v35 = vmul.f32 1.442695, %v476_v31  ;;  %v545_v16 = vsel %vm412_vm2, %v1232_v32, 0.0  ;;  %v1236_v37 = vpop.eup %915 }
 0x2a9   :  { %919 = vpow2.f32 %v491_v33  ;;  %537 = vadd.xlane.f32.xlu0 %v536_v38  ;;  %v551_v11 = vsel %vm412_vm2, %v1236_v37, 0.0  ;;  %546 = vadd.xlane.f32.xlu1 %v545_v16  ;;  %v1243_v40 = vpop.eup %917 }
 0x2aa   :  { %921 = vpow2.f32 %v507_v35  ;;  %552 = vadd.xlane.f32.xlu2 %v551_v11  ;;  %v548_v46 = vsel %vm412_vm2, %v1243_v40, 0.0 }
 0x2ac   :  { %v445_v12 = vpop.xlane.xlu2 %444 }
 0x2ad   :  { %v471_v39 = vsub.f32 %v1178_v18, %v445_v12 }
 0x2af   :  { %v1245_v41 = vpop.eup %919  ;;  %v497_v42 = vmul.f32 1.442695, %v471_v39 }
 0x2b0   :  { %v1247_v43 = vpop.eup %921  ;;  %v530_v45 = vsel %vm412_vm2, %v1245_v41, 0.0 }
 0x2b1   :  { %923 = vpow2.f32 %v497_v42  ;;  %v554_v47 = vsel %vm412_vm2, %v1247_v43, 0.0  ;;  %531 = vadd.xlane.f32.xlu0 %v530_v45  ;;  %549 = vadd.xlane.f32.xlu1 %v548_v46 }
 0x2b2   :  { %555 = vadd.xlane.f32.xlu2 %v554_v47 }
 0x2b4   :  { %v448_v18 = vpop.xlane.xlu2 %447 }
 0x2b5   :  { %v472_v48 = vsub.f32 %v1182_v22, %v448_v18 }
 0x2b7   :  { %v1256_v49 = vpop.eup %923  ;;  %v499_v50 = vmul.f32 1.442695, %v472_v48 }
 0x2b8   :  { %v539_v53 = vsel %vm412_vm2, %v1256_v49, 0.0 }
 0x2b9   :  { %925 = vpow2.f32 %v499_v50  ;;  %540 = vadd.xlane.f32.xlu0 %v539_v53 }
 0x2bf   :  { %v1260_v54 = vpop.eup %925 }
 0x2c0   :  { %v542_v57 = vsel %vm412_vm2, %v1260_v54, 0.0 }
 0x2c1   :  { %543 = vadd.xlane.f32.xlu0 %v542_v57 }
 0x2ca   :  { %697 = vrot.lane.b32.xlu2 %v1111_v21, %s1042_s2  ;;  %661 = vrot.lane.b32.xlu1 %v1107_v19, %s1042_s2  ;;  %v1277_v21 = vpop.permute.xlu2 %625 }
 0x2d2   :  { %890 = vrot.lane.b32.xlu2 %v889_v7, %s1043_s25  ;;  %749 = vrot.lane.b32.xlu1 %v1096_v13, %s1043_s25 }
 0x2d5   :  { %589 = vrot.lane.b32.xlu0 %v1099_v15, %s1042_s2 }
 0x2db   :  { %v511_v22 = vpop.xlane.xlu1 %510 }
 0x2dd   :  { %885 = vrot.lane.b32.xlu0 %v884_v6, %s1043_s25 }
 0x2e3   :  { %v514_v58 = vpop.xlane.xlu1 %513 }
 0x2eb   :  { %v517_v19 = vpop.xlane.xlu1 %516 }
 0x304   :  { %v523_v55 = vpop.xlane.xlu2 %522 }
 0x30c   :  { %v526_v62 = vpop.xlane.xlu0 %525 }
 0x314   :  { %v1279_v63 = vpop.xlane.xlu0 %534  ;;  %v529_v5 = vpop.xlane.xlu1 %528 }
 0x315   :  { %v520_v4 = vpop.xlane.xlu2 %519 }
 0x316   :  { %927 = vrcp.f32 %v520_v4 }
 0x317   :  { %929 = vrcp.f32 %v517_v19 }
 0x318   :  { %931 = vrcp.f32 %v514_v58 }
 0x319   :  { %933 = vrcp.f32 %v511_v22 }
 0x31c   :  { %v928_v7 = vpop.eup %927  ;;  %v538_v13 = vpop.xlane.xlu0 %537 }
 0x31d   :  { %v553_v15 = vpop.xlane.xlu2 %552  ;;  %v576_v2 = vmul.f32 %v928_v7, %v1220_v24  ;;  %v930_v3 = vpop.eup %929 }
 0x31e   :  { %v547_v6 = vpop.xlane.xlu1 %546  ;;  %v575_v0 = vmul.f32 %v930_v3, %v1196_v36  ;;  %v932_v8 = vpop.eup %931 }
 0x31f   :  { %837 = vmatpush.xpose.msk.msrb.mxu2 %vm412_vm2, %v576_v2  ;;  %v574_v10 = vmul.f32 %v932_v8, %v1192_v34  ;;  %v934_v14 = vpop.eup %933 }
 0x320   :  { %v573_v60 = vmul.f32 %v934_v14, %v1188_v29 }
 0x323   :  { %838 = vmatpush.xpose.msk.msrb.mxu2 %vm412_vm2, %v575_v0 }
 0x324   :  { %v532_v61 = vpop.xlane.xlu0 %531 }
 0x325   :  { %935 = vrcp.f32 %v532_v61  ;;  %v556_v9 = vpop.xlane.xlu2 %555 }
 0x326   :  { %937 = vrcp.f32 %v556_v9  ;;  %v550_v17 = vpop.xlane.xlu1 %549 }
 0x327   :  { %939 = vrcp.f32 %v529_v5  ;;  %839 = vmatpush.xpose.msk.msrb.mxu2 %vm412_vm2, %v574_v10 }
 0x328   :  { %941 = vrcp.f32 %v553_v15 }
 0x329   :  { %943 = vrcp.f32 %v526_v62 }
 0x32a   :  { %945 = vrcp.f32 %v550_v17 }
 0x32b   :  { %v936_v23 = vpop.eup %935  ;;  %840 = vmatpush.xpose.msk.msrb.mxu2 %vm412_vm2, %v573_v60  ;;  %947 = vrcp.f32 %v523_v55 }
 0x32c   :  { %v938_v36 = vpop.eup %937  ;;  %v541_v24 = vpop.xlane.xlu0 %540  ;;  %v580_v25 = vmul.f32 %v936_v23, %v1245_v41  ;;  %949 = vrcp.f32 %v547_v6 }
 0x32d   :  { %v940_v52 = vpop.eup %939  ;;  %v588_v34 = vmul.f32 %v938_v36, %v1247_v43 }
 0x32e   :  { %v942_v26 = vpop.eup %941  ;;  %842 = vmatpush.xpose.msk.msrb.mxu3 %vm412_vm2, %v580_v25  ;;  %v579_v29 = vmul.f32 %v940_v52, %v1217_v20 }
 0x32f   :  { %852 = vmatpush.xpose.msk.msra.mxu2 %vm412_vm2, %v588_v34  ;;  %v944_v1 = vpop.eup %943  ;;  %v587_v27 = vmul.f32 %v942_v26, %v1236_v37 }
 0x330   :  { %v946_v59 = vpop.eup %945  ;;  %v578_v31 = vmul.f32 %v944_v1, %v1208_v56 }
 0x331   :  { %v948_v33 = vpop.eup %947  ;;  %v586_v35 = vmul.f32 %v946_v59, %v1243_v40  ;;  %v698_v40 = vpop.permute.xlu2 %697 }
 0x332   :  { %843 = vmatpush.xpose.msk.msrb.mxu3 %vm412_vm2, %v579_v29  ;;  %v950_v16 = vpop.eup %949  ;;  %v577_v20 = vmul.f32 %v948_v33, %v1201_v44 }
 0x333   :  { %853 = vmatpush.xpose.msk.msra.mxu2 %vm412_vm2, %v587_v27  ;;  %v585_v37 = vmul.f32 %v950_v16, %v1232_v32 }
 0x334   :  { %v544_v28 = vpop.xlane.xlu0 %543 }
 0x335   :  { %951 = vrcp.f32 %v544_v28 }
 0x336   :  { %844 = vmatpush.xpose.msk.msrb.mxu3 %vm412_vm2, %v578_v31  ;;  %953 = vrcp.f32 %v541_v24 }
 0x337   :  { %854 = vmatpush.xpose.msk.msra.mxu2 %vm412_vm2, %v586_v35  ;;  %955 = vrcp.f32 %v538_v13 }
 0x338   :  { %957 = vrcp.f32 %v1279_v63 }
 0x339   :  { %v891_v46 = vpop.permute.xlu2 %890 }
 0x33a   :  { %845 = vmatpush.xpose.msk.msrb.mxu3 %vm412_vm2, %v577_v20  ;;  %v892_v18 = vunpack.i.l.bf16 %v891_v46  ;;  %v893_v48 = vunpack.i.h.bf16 %v891_v46 }
 0x33b   :  { %v952_v38 = vpop.eup %951  ;;  %855 = vmatpush.xpose.msk.msra.mxu2 %vm412_vm2, %v585_v37 }
 0x33c   :  { %v584_v56 = vmul.f32 %v952_v38, %v1260_v54  ;;  %v954_v11 = vpop.eup %953  ;;  %v662_v43 = vpop.permute.xlu1 %661 }
 0x33d   :  { %846 = vmatmul.msk.f32.vlgmr.msrb.gmra.mxu3 %vm412_vm2, %v1277_v21  ;;  %v583_v44 = vmul.f32 %v954_v11, %v1256_v49  ;;  %v956_v12 = vpop.eup %955 }
 0x33e   :  { %847 = vmatpush.xpose.msk.msrb.mxu0 %vm412_vm2, %v584_v56  ;;  %v582_v32 = vmul.f32 %v956_v12, %v1229_v30  ;;  %v958_v39 = vpop.eup %957 }
 0x33f   :  { %v581_v42 = vmul.f32 %v958_v39, %v1214_v51 }
 0x342   :  { %848 = vmatpush.xpose.msk.msrb.mxu0 %vm412_vm2, %v583_v44 }
 0x344   :  { %v750_v54 = vpop.permute.xlu1 %749 }
 0x346   :  { %849 = vmatpush.xpose.msk.msrb.mxu0 %vm412_vm2, %v582_v32 }
 0x347   :  { %v590_v41 = vpop.permute.xlu0 %589 }
 0x348   :  { %841 = vmatmul.msk.f32.vlgmr.msrb.gmra.mxu2 %vm412_vm2, %v590_v41 }
 0x34a   :  { %850 = vmatpush.xpose.msk.msrb.mxu0 %vm412_vm2, %v581_v42 }
 0x34d   :  { %851 = vmatmul.msk.f32.vlgmr.msrb.gmra.mxu0 %vm412_vm2, %v662_v43 }
 0x34f   :  { %v886_v45 = vpop.permute.xlu0 %885 }
 0x350   :  { %856 = vmatmul.msk.f32.vlgmr.msra.gmra.mxu2 %vm412_vm2, %v698_v40  ;;  %v888_v47 = vunpack.i.h.bf16 %v886_v45  ;;  %v887_v30 = vunpack.i.l.bf16 %v886_v45 }
 0x352   :  { %861 = vmatpush.msra.mxu3 %v887_v30  ;;  %776 = vmatpush.msra.mxu0 %v887_v30 }
 0x354   :  { %862 = vmatpush.msra.mxu3 %v888_v47  ;;  %777 = vmatpush.msra.mxu0 %v888_v47 }
 0x356   :  { %863 = vmatpush.msra.mxu3 %v892_v18  ;;  %778 = vmatpush.msra.mxu0 %v892_v18 }
 0x358   :  { %864 = vmatpush.msra.mxu3 %v893_v48  ;;  %779 = vmatpush.msra.mxu0 %v893_v48 }
 0x3c0   :  { %v658_v51 = vpop.f32.mrf.mxu3 }
 0x3c1   :  { %858 = vmatmul.msk.f32.vlgmr.msra.gmra.mxu3 %vm412_vm2, %v658_v51 }
 0x3ca   :  { %v694_v49 = vpop.f32.mrf.mxu0 }
 0x3cb   :  { %v622_v50 = vpop.f32.mrf.mxu2  ;;  %859 = vmatmul.msk.f32.gmra.mxu3 %vm412_vm2, %v694_v49 }
 0x3cc   :  { %857 = vmatmul.msk.f32.vlgmr.msra.gmra.mxu0 %vm412_vm2, %v622_v50 }
 0x3d3   :  { %v730_v53 = vpop.f32.mrf.mxu2 }
 0x3d4   :  { %860 = vmatmul.msk.f32.gmra.mxu3 %vm412_vm2, %v730_v53 }
 0x444   :  { %v784_v57 = vpop.f32.mrf.mxu3 }
 0x445   :  { %v785_v22 = vadd.f32 %v784_v57, %v750_v54 }
 0x447   :  { %794 = vst.msk [vmem:[#allocation7 + $0x8] sm:$0xff] %vm412_vm2, %v785_v22 }
 0x449   :  { %v781_v58 = vpop.f32.mrf.mxu0 }
 0x44a   :  { %v782_v21 = vadd.f32 %v781_v58, %v750_v54 }
 0x44c   :  { %793 = vst.msk [vmem:[#allocation7] sm:$0xff] %vm412_vm2, %v782_v21 }
 0x44e   :  { %v787_v62 = vpop.f32.mrf.mxu3 }
 0x44f   :  { %v788_v19 = vadd.f32 %v787_v62, %v750_v54 }
 0x451   :  { %795 = vst.msk [vmem:[#allocation7 + $0x10] sm:$0xff] %vm412_vm2, %v788_v19 }
 0x457   :  { %v790_v55 = vpop.f32.mrf.mxu3 }
 0x458   :  { %v791_v63 = vadd.f32 %v790_v55, %v750_v54 }
 0x45a   :  { %796 = vst.msk [vmem:[#allocation7 + $0x18] sm:$0xff] %vm412_vm2, %v791_v63 }
 0x45b   :  { %809 = dma.vmem_to_hbm [thread:$0]  %s802_s27, 512, %s804_s30, [#allocation4], %s1038_s20, %s1038_s20, %s1039_s21  }
 0x45c   :  { %1035 = dma.done.wait [#allocation4], 512  }
 0x45d   :  { %1036 = vsyncadd [#allocation4], 4294966784 }
 0x45e   :  { %814 = vsyncpa [#allocation3], 1 }
 0x45f   :  { %815 = vsyncpa [#allocation6], 1 }
 0x460   :  { %816 = vsyncpa [#allocation4], 1 }

</bundles_post_ra>
